<compile_context>
chip_gen: v7x
topology: tpu7x:2x2x1
jax: 0.10.0
libtpu: 0.0.40
codegen_flags: <defaults>
</compile_context>

<pallas_src>
import functools

import jax
import jax.numpy as jnp
from jax import lax
from jax.experimental import pallas as pl
from jax.experimental.pallas import tpu as pltpu


# ----------------------------------------------------------------------------
# Fused multi-head attention + output projection kernel.
# ----------------------------------------------------------------------------
def _mha_fused_kernel(x_ref, wq_ref, wkv_ref, wp_ref, bp_ref, o_ref,
                      k_scr, v_scr, *, num_heads, head_dim, tq):
    # x_ref:   (1, T, C)  f32   current batch element (resident across qi)
    # wq_ref:  (C, H*C)   bf16  fused per-head query weights (scale folded in)
    # wkv_ref: (C, 2*H*C) bf16  fused per-head key|value weights
    # wp_ref:  (H*C, C)   bf16  output projection weight (in, out)
    # bp_ref:  (1, C)     f32   output projection bias
    # o_ref:   (1, tq, C)       output block
    # k_scr/v_scr: (T, H*C) bf16 VMEM scratch, persists across query blocks
    H, C = num_heads, head_dim
    HC = H * C
    qi = pl.program_id(1)

    # Compute K and V for the whole sequence once per batch element.
    # NOTE: only valid because the query-block axis is the innermost,
    # sequential ("arbitrary") grid axis — k_scr/v_scr carry across qi.
    @pl.when(qi == 0)
    def _():
        x_full = x_ref[0].astype(jnp.bfloat16)                       # (T, C)
        kv = jnp.dot(x_full, wkv_ref[...],
                     preferred_element_type=jnp.float32)             # (T, 2HC)
        k_scr[...] = kv[:, :HC].astype(jnp.bfloat16)
        v_scr[...] = kv[:, HC:].astype(jnp.bfloat16)

    # Query rows for this block (1/sqrt(C) already folded into wq).
    start = pl.multiple_of(qi * tq, tq)
    xq = x_ref[0, pl.ds(start, tq), :].astype(jnp.bfloat16)          # (tq, C)
    q = jnp.dot(xq, wq_ref[...],
                preferred_element_type=jnp.float32).astype(jnp.bfloat16)  # (tq, HC)

    # Per-head attention.  Static (== unrolled) loop; H is small here.
    # TODO(synk): lax.fori_loop + head-major scratch for H >= ~8.
    outs = []
    for h in range(H):
        lo = h * C
        q_h = q[:, lo:lo + C]                                        # (tq, C) bf16
        k_h = k_scr[:, lo:lo + C]                                    # (T, C)  bf16
        v_h = v_scr[:, lo:lo + C]                                    # (T, C)  bf16

        # scores: contract last dims (no explicit k.T / XLU transpose)
        s = lax.dot_general(q_h, k_h,
                            dimension_numbers=(((1,), (1,)), ((), ())),
                            preferred_element_type=jnp.float32)      # (tq, T) f32

        m = jnp.max(s, axis=-1, keepdims=True)
        p = jnp.exp(s - m)                                           # f32
        denom = jnp.sum(p, axis=-1, keepdims=True)                   # (tq, 1)

        # att@V on the UN-normalized probabilities (bf16 into the MXU);
        # normalize the small (tq, C) result instead of the (tq, T) tile.
        out_h = jnp.dot(p.astype(jnp.bfloat16), v_h,
                        preferred_element_type=jnp.float32)          # (tq, C)
        out_h = out_h * pl.reciprocal(denom, approx=True)            # EUP
        outs.append(out_h.astype(jnp.bfloat16))

    # Single output projection with full H*C contraction depth on the MXU.
    heads = jnp.concatenate(outs, axis=-1)                           # (tq, HC)
    o = jnp.dot(heads, wp_ref[...],
                preferred_element_type=jnp.float32) + bp_ref[...]    # (tq, C)
    o_ref[0] = o.astype(o_ref.dtype)


def _pick_tq(T, cap=256):
    """Largest multiple-of-8 divisor of T that is <= cap (or T if T <= cap)."""
    if T <= cap:
        return T
    for cand in range(cap - cap % 8, 7, -8):
        if T % cand == 0:
            return cand
    return T


def multi_head_attention(x, wq, wk, wv, w_proj, b_proj, *, tq=None):
    """x: (B, T, C); wq/wk/wv: (H, C, C) in (in, out) orientation;
    w_proj: (H*C, C) in (in, out) orientation; b_proj: (C,).
    tq: query-block size (must divide T and be a multiple of 8, or None)."""
    B, T, C = x.shape
    H = wq.shape[0]
    HC = H * C

    if tq is None:
        tq = _pick_tq(T)
    assert T % tq == 0, "tq must divide T"
    assert tq == T or tq % 8 == 0, "tq must be a multiple of 8 (or equal T)"
    nq = T // tq

    # One-time repack: fused, lane-dense bf16 MXU operands; scale folded in.
    scale = 1.0 / (C ** 0.5)
    wq_cat = (jnp.transpose(wq, (1, 0, 2)).reshape(C, HC) * scale
              ).astype(jnp.bfloat16)                                 # (C, HC)
    wk_cat = jnp.transpose(wk, (1, 0, 2)).reshape(C, HC)
    wv_cat = jnp.transpose(wv, (1, 0, 2)).reshape(C, HC)
    w_kv = jnp.concatenate([wk_cat, wv_cat], axis=-1
                           ).astype(jnp.bfloat16)                    # (C, 2HC)
    wp_bf = w_proj.astype(jnp.bfloat16)                              # (HC, C)
    bp = b_proj.astype(jnp.float32).reshape(1, C)

    kernel = functools.partial(_mha_fused_kernel,
                               num_heads=H, head_dim=C, tq=tq)

    # Explicit scoped-VMEM budget: double-buffered blocks + K/V scratch +
    # live f32 intermediates, 1.5x headroom, capped at 64 MiB (v7x-safe).
    xb = x.dtype.itemsize
    w_bytes = 2 * (wq_cat.size + w_kv.size + wp_bf.size) + 4 * C
    vmem_est = (2 * T * C * xb                # x block, double-buffered
                + 2 * w_bytes                 # weights, double-buffered
                + 2 * tq * C * xb             # out block, double-buffered
                + 2 * T * HC * 2              # K + V scratch (bf16)
                + 4 * tq * T * 4              # live (tq, T) f32 score tiles
                + 4 * tq * HC * 4)            # q / heads / proj intermediates
    vmem_limit = max(32 << 20, min(int(1.5 * vmem_est) + (4 << 20), 64 << 20))

    cost = pl.CostEstimate(
        flops=B * (2 * T * C * HC             # fused Q matmul
                   + 2 * T * C * 2 * HC       # fused K|V matmul
                   + 4 * H * T * T * C        # QK^T and att @ V
                   + 2 * T * HC * C),         # output projection
        transcendentals=B * H * T * T,        # softmax exp
        bytes_accessed=(xb * x.size
                        + 2 * (wq_cat.size + w_kv.size + wp_bf.size)
                        + 4 * C + xb * B * T * C),
    )

    return pl.pallas_call(
        kernel,
        out_shape=jax.ShapeDtypeStruct((B, T, C), x.dtype),
        grid_spec=pltpu.PrefetchScalarGridSpec(
            num_scalar_prefetch=0,
            grid=(B, nq),
            in_specs=[
                pl.BlockSpec((1, T, C), lambda b, qi: (b, 0, 0)),    # x
                pl.BlockSpec((C, HC), lambda b, qi: (0, 0)),         # w_q fused
                pl.BlockSpec((C, 2 * HC), lambda b, qi: (0, 0)),     # w_kv fused
                pl.BlockSpec((HC, C), lambda b, qi: (0, 0)),         # w_proj
                pl.BlockSpec((1, C), lambda b, qi: (0, 0)),          # bias
            ],
            out_specs=pl.BlockSpec((1, tq, C), lambda b, qi: (b, qi, 0)),
            scratch_shapes=[
                pltpu.VMEM((T, HC), jnp.bfloat16),                   # K scratch
                pltpu.VMEM((T, HC), jnp.bfloat16),                   # V scratch
            ],
        ),
        # Batch axis parallel (megacore on v7x); the query axis MUST stay
        # sequential ("arbitrary") so the K/V scratch carry remains valid.
        compiler_params=pltpu.CompilerParams(
            dimension_semantics=("parallel", "arbitrary"),
            vmem_limit_bytes=vmem_limit),
        cost_estimate=cost,
    )(x, wq_cat, w_kv, wp_bf, bp)


# ----------------------------------------------------------------------------
# Pure-JAX f32 reference (mirrors the PyTorch forward) for a correctness check.
# ----------------------------------------------------------------------------
def _reference(x, wq, wk, wv, w_proj, b_proj):
    outs = []
    C = x.shape[-1]
    for h in range(wq.shape[0]):
        q = x @ wq[h]
        k = x @ wk[h]
        v = x @ wv[h]
        att = (q @ jnp.swapaxes(k, -2, -1)) * (1.0 / C ** 0.5)
        att = jax.nn.softmax(att, axis=-1)
        outs.append(att @ v)
    cat = jnp.concatenate(outs, axis=-1)
    return cat @ w_proj + b_proj


if __name__ == "__main__":
    # Small shapes: batch=2, seq=8, n_embd=32, num_heads=4  (H*C = 128 lanes)
    B, T, C, H = 2, 8, 32, 4

    key = jax.random.PRNGKey(0)
    kx, kq, kk, kv, kw, kb = jax.random.split(key, 6)

    x = jax.random.normal(kx, (B, T, C), dtype=jnp.float32)

    lim_head = 1.0 / (C ** 0.5)
    wq = jax.random.uniform(kq, (H, C, C), jnp.float32, -lim_head, lim_head)
    wk = jax.random.uniform(kk, (H, C, C), jnp.float32, -lim_head, lim_head)
    wv = jax.random.uniform(kv, (H, C, C), jnp.float32, -lim_head, lim_head)

    lim_proj = 1.0 / ((C * H) ** 0.5)
    w_proj = jax.random.uniform(kw, (H * C, C), jnp.float32, -lim_proj, lim_proj)
    b_proj = jax.random.uniform(kb, (C,), jnp.float32, -lim_proj, lim_proj)

    # bf16 MXU operands + approx EUP reciprocal trade ~1e-2 relative error
    # vs the f32 reference.
    TOL = dict(atol=3e-2, rtol=3e-2)

    # --- main check: single query block per batch element ---
    out = multi_head_attention(x, wq, wk, wv, w_proj, b_proj)
    out = jax.block_until_ready(out)
    ref = _reference(x, wq, wk, wv, w_proj, b_proj)
    assert out.shape == (B, T, C)
    assert jnp.allclose(out, ref, **TOL), "mismatch vs reference"

    # --- secondary check: exercise the multi-query-block / K,V-scratch path ---
    T2 = 16
    x2 = jax.random.normal(jax.random.PRNGKey(1), (B, T2, C), dtype=jnp.float32)
    out2 = multi_head_attention(x2, wq, wk, wv, w_proj, b_proj, tq=8)
    out2 = jax.block_until_ready(out2)
    ref2 = _reference(x2, wq, wk, wv, w_proj, b_proj)
    assert jnp.allclose(out2, ref2, **TOL), "mismatch (tiled q)"

    print("KERNEL_OK")
</pallas_src>

<mosaic_0001>
module attributes {stable_mosaic.version = 11 : i64} {
  func.func @_mha_fused_kernel(%arg0: i32, %arg1: i32, %arg2: memref<1x8x32xf32, #tpu.memory_space<vmem>>, %arg3: memref<32x128xbf16, #tpu.memory_space<vmem>>, %arg4: memref<32x256xbf16, #tpu.memory_space<vmem>>, %arg5: memref<128x32xbf16, #tpu.memory_space<vmem>>, %arg6: memref<1x32xf32, #tpu.memory_space<vmem>>, %arg7: memref<1x8x32xf32, #tpu.memory_space<vmem>>, %arg8: memref<8x128xbf16, #tpu.memory_space<vmem>>, %arg9: memref<8x128xbf16, #tpu.memory_space<vmem>>) attributes {dimension_semantics = [#tpu.dimension_semantics<parallel>, #tpu.dimension_semantics<arbitrary>], iteration_bounds = array<i64: 2, 1>, scalar_prefetch = 0 : i64, scratch_operands = 2 : i64, tpu.core_type = #tpu.core_type<tc>, window_params = [{transform_indices = @transform_0, window_bounds = array<i64: 1, 8, 32>}, {pipeline_mode = #tpu.pipeline_mode<synchronous>, transform_indices = @transform_1, window_bounds = array<i64: 32, 128>}, {pipeline_mode = #tpu.pipeline_mode<synchronous>, transform_indices = @transform_2, window_bounds = array<i64: 32, 256>}, {pipeline_mode = #tpu.pipeline_mode<synchronous>, transform_indices = @transform_3, window_bounds = array<i64: 128, 32>}, {pipeline_mode = #tpu.pipeline_mode<synchronous>, transform_indices = @transform_4, window_bounds = array<i64: 1, 32>}, {transform_indices = @transform_5, window_bounds = array<i64: 1, 8, 32>}]} {
    %c0_i32 = arith.constant 0 : i32
    %0 = arith.cmpi eq, %arg1, %c0_i32 : i32
    %1 = arith.extui %0 : i1 to i32
    %c0_i32_0 = arith.constant 0 : i32
    %2 = arith.cmpi ne, %1, %c0_i32_0 : i32
    scf.if %2 {
      %c0_41 = arith.constant 0 : index
      %c0_42 = arith.constant 0 : index
      %c0_43 = arith.constant 0 : index
      %89 = vector.load %arg2[%c0_41, %c0_42, %c0_43] : memref<1x8x32xf32, #tpu.memory_space<vmem>>, vector<1x8x32xf32>
      %90 = vector.shape_cast %89 : vector<1x8x32xf32> to vector<8x32xf32>
      %91 = arith.truncf %90 : vector<8x32xf32> to vector<8x32xbf16>
      %c0_44 = arith.constant 0 : index
      %c0_45 = arith.constant 0 : index
      %92 = vector.load %arg4[%c0_44, %c0_45] : memref<32x256xbf16, #tpu.memory_space<vmem>>, vector<32x256xbf16>
      %cst_46 = arith.constant dense<0.000000e+00> : vector<8x256xf32>
      %93 = tpu.matmul %91, %92, %cst_46 {dimension_numbers = #tpu.dot_dimension_numbers<[1], [0], [0], [1], [0, 0, 1, 1], [], []>} : vector<8x32xbf16>, vector<32x256xbf16>, vector<8x256xf32> -> vector<8x256xf32>
      %94 = vector.extract_strided_slice %93 {offsets = [0, 0], sizes = [8, 128], strides = [1, 1]} : vector<8x256xf32> to vector<8x128xf32>
      %95 = arith.truncf %94 : vector<8x128xf32> to vector<8x128xbf16>
      %c0_47 = arith.constant 0 : index
      %c0_48 = arith.constant 0 : index
      %96 = vector.load %arg8[%c0_47, %c0_48] : memref<8x128xbf16, #tpu.memory_space<vmem>>, vector<8x128xbf16>
      tpu.vector_store %arg8[%c0_47, %c0_48], %95 {strides = array<i32>} : memref<8x128xbf16, #tpu.memory_space<vmem>>, vector<8x128xbf16>,
      %97 = vector.extract_strided_slice %93 {offsets = [0, 128], sizes = [8, 128], strides = [1, 1]} : vector<8x256xf32> to vector<8x128xf32>
      %98 = arith.truncf %97 : vector<8x128xf32> to vector<8x128xbf16>
      %c0_49 = arith.constant 0 : index
      %c0_50 = arith.constant 0 : index
      %99 = vector.load %arg9[%c0_49, %c0_50] : memref<8x128xbf16, #tpu.memory_space<vmem>>, vector<8x128xbf16>
      tpu.vector_store %arg9[%c0_49, %c0_50], %98 {strides = array<i32>} : memref<8x128xbf16, #tpu.memory_space<vmem>>, vector<8x128xbf16>,
    } else {
    }
    %c8_i32 = arith.constant 8 : i32
    %3 = arith.muli %arg1, %c8_i32 : i32
    %4 = tpu.assume_multiple %3, 8 : i32
    %c0 = arith.constant 0 : index
    %5 = arith.index_cast %4 : i32 to index
    %c0_1 = arith.constant 0 : index
    %6 = vector.load %arg2[%c0, %5, %c0_1] : memref<1x8x32xf32, #tpu.memory_space<vmem>>, vector<1x8x32xf32>
    %7 = vector.shape_cast %6 : vector<1x8x32xf32> to vector<8x32xf32>
    %8 = arith.truncf %7 : vector<8x32xf32> to vector<8x32xbf16>
    %c0_2 = arith.constant 0 : index
    %c0_3 = arith.constant 0 : index
    %9 = vector.load %arg3[%c0_2, %c0_3] : memref<32x128xbf16, #tpu.memory_space<vmem>>, vector<32x128xbf16>
    %cst = arith.constant dense<0.000000e+00> : vector<8x128xf32>
    %10 = tpu.matmul %8, %9, %cst {dimension_numbers = #tpu.dot_dimension_numbers<[1], [0], [0], [1], [0, 0, 1, 1], [], []>} : vector<8x32xbf16>, vector<32x128xbf16>, vector<8x128xf32> -> vector<8x128xf32>
    %11 = arith.truncf %10 : vector<8x128xf32> to vector<8x128xbf16>
    %12 = vector.extract_strided_slice %11 {offsets = [0, 0], sizes = [8, 32], strides = [1, 1]} : vector<8x128xbf16> to vector<8x32xbf16>
    %c0_4 = arith.constant 0 : index
    %c0_5 = arith.constant 0 : index
    %13 = vector.load %arg8[%c0_4, %c0_5] : memref<8x128xbf16, #tpu.memory_space<vmem>>, vector<8x32xbf16>
    %c0_6 = arith.constant 0 : index
    %c0_7 = arith.constant 0 : index
    %14 = vector.load %arg9[%c0_6, %c0_7] : memref<8x128xbf16, #tpu.memory_space<vmem>>, vector<8x32xbf16>
    %cst_8 = arith.constant dense<0.000000e+00> : vector<8x8xf32>
    %15 = tpu.matmul %12, %13, %cst_8 {dimension_numbers = #tpu.dot_dimension_numbers<[1], [1], [0], [0], [0, 0, 1, 0], [], []>} : vector<8x32xbf16>, vector<8x32xbf16>, vector<8x8xf32> -> vector<8x8xf32>
    %cst_9 = arith.constant dense<0xFF800000> : vector<8xf32>
    %16 = vector.multi_reduction <maximumf>, %15, %cst_9 [1] : vector<8x8xf32> to vector<8xf32>
    %17 = vector.shape_cast %16 : vector<8xf32> to vector<8x1xf32>
    %18 = vector.broadcast %17 : vector<8x1xf32> to vector<8x8xf32>
    %19 = arith.subf %15, %18 : vector<8x8xf32>
    %20 = math.exp %19 : vector<8x8xf32>
    %cst_10 = arith.constant dense<0.000000e+00> : vector<8xf32>
    %21 = vector.multi_reduction <add>, %20, %cst_10 [1] : vector<8x8xf32> to vector<8xf32>
    %22 = vector.shape_cast %21 : vector<8xf32> to vector<8x1xf32>
    %23 = arith.truncf %20 : vector<8x8xf32> to vector<8x8xbf16>
    %cst_11 = arith.constant dense<0.000000e+00> : vector<8x32xf32>
    %24 = tpu.matmul %23, %14, %cst_11 {dimension_numbers = #tpu.dot_dimension_numbers<[1], [0], [0], [1], [0, 0, 1, 1], [], []>} : vector<8x8xbf16>, vector<8x32xbf16>, vector<8x32xf32> -> vector<8x32xf32>
    %25 = tpu.reciprocal %22 {approx = true} : vector<8x1xf32> -> vector<8x1xf32>
    %26 = vector.broadcast %25 : vector<8x1xf32> to vector<8x32xf32>
    %27 = arith.mulf %24, %26 : vector<8x32xf32>
    %28 = arith.truncf %27 : vector<8x32xf32> to vector<8x32xbf16>
    %29 = vector.extract_strided_slice %11 {offsets = [0, 32], sizes = [8, 32], strides = [1, 1]} : vector<8x128xbf16> to vector<8x32xbf16>
    %c0_12 = arith.constant 0 : index
    %c32 = arith.constant 32 : index
    %30 = vector.load %arg8[%c0_12, %c32] : memref<8x128xbf16, #tpu.memory_space<vmem>>, vector<8x32xbf16>
    %c0_13 = arith.constant 0 : index
    %c32_14 = arith.constant 32 : index
    %31 = vector.load %arg9[%c0_13, %c32_14] : memref<8x128xbf16, #tpu.memory_space<vmem>>, vector<8x32xbf16>
    %cst_15 = arith.constant dense<0.000000e+00> : vector<8x8xf32>
    %32 = tpu.matmul %29, %30, %cst_15 {dimension_numbers = #tpu.dot_dimension_numbers<[1], [1], [0], [0], [0, 0, 1, 0], [], []>} : vector<8x32xbf16>, vector<8x32xbf16>, vector<8x8xf32> -> vector<8x8xf32>
    %cst_16 = arith.constant dense<0xFF800000> : vector<8xf32>
    %33 = vector.multi_reduction <maximumf>, %32, %cst_16 [1] : vector<8x8xf32> to vector<8xf32>
    %34 = vector.shape_cast %33 : vector<8xf32> to vector<8x1xf32>
    %35 = vector.broadcast %34 : vector<8x1xf32> to vector<8x8xf32>
    %36 = arith.subf %32, %35 : vector<8x8xf32>
    %37 = math.exp %36 : vector<8x8xf32>
    %cst_17 = arith.constant dense<0.000000e+00> : vector<8xf32>
    %38 = vector.multi_reduction <add>, %37, %cst_17 [1] : vector<8x8xf32> to vector<8xf32>
    %39 = vector.shape_cast %38 : vector<8xf32> to vector<8x1xf32>
    %40 = arith.truncf %37 : vector<8x8xf32> to vector<8x8xbf16>
    %cst_18 = arith.constant dense<0.000000e+00> : vector<8x32xf32>
    %41 = tpu.matmul %40, %31, %cst_18 {dimension_numbers = #tpu.dot_dimension_numbers<[1], [0], [0], [1], [0, 0, 1, 1], [], []>} : vector<8x8xbf16>, vector<8x32xbf16>, vector<8x32xf32> -> vector<8x32xf32>
    %42 = tpu.reciprocal %39 {approx = true} : vector<8x1xf32> -> vector<8x1xf32>
    %43 = vector.broadcast %42 : vector<8x1xf32> to vector<8x32xf32>
    %44 = arith.mulf %41, %43 : vector<8x32xf32>
    %45 = arith.truncf %44 : vector<8x32xf32> to vector<8x32xbf16>
    %46 = vector.extract_strided_slice %11 {offsets = [0, 64], sizes = [8, 32], strides = [1, 1]} : vector<8x128xbf16> to vector<8x32xbf16>
    %c0_19 = arith.constant 0 : index
    %c64 = arith.constant 64 : index
    %47 = vector.load %arg8[%c0_19, %c64] : memref<8x128xbf16, #tpu.memory_space<vmem>>, vector<8x32xbf16>
    %c0_20 = arith.constant 0 : index
    %c64_21 = arith.constant 64 : index
    %48 = vector.load %arg9[%c0_20, %c64_21] : memref<8x128xbf16, #tpu.memory_space<vmem>>, vector<8x32xbf16>
    %cst_22 = arith.constant dense<0.000000e+00> : vector<8x8xf32>
    %49 = tpu.matmul %46, %47, %cst_22 {dimension_numbers = #tpu.dot_dimension_numbers<[1], [1], [0], [0], [0, 0, 1, 0], [], []>} : vector<8x32xbf16>, vector<8x32xbf16>, vector<8x8xf32> -> vector<8x8xf32>
    %cst_23 = arith.constant dense<0xFF800000> : vector<8xf32>
    %50 = vector.multi_reduction <maximumf>, %49, %cst_23 [1] : vector<8x8xf32> to vector<8xf32>
    %51 = vector.shape_cast %50 : vector<8xf32> to vector<8x1xf32>
    %52 = vector.broadcast %51 : vector<8x1xf32> to vector<8x8xf32>
    %53 = arith.subf %49, %52 : vector<8x8xf32>
    %54 = math.exp %53 : vector<8x8xf32>
    %cst_24 = arith.constant dense<0.000000e+00> : vector<8xf32>
    %55 = vector.multi_reduction <add>, %54, %cst_24 [1] : vector<8x8xf32> to vector<8xf32>
    %56 = vector.shape_cast %55 : vector<8xf32> to vector<8x1xf32>
    %57 = arith.truncf %54 : vector<8x8xf32> to vector<8x8xbf16>
    %cst_25 = arith.constant dense<0.000000e+00> : vector<8x32xf32>
    %58 = tpu.matmul %57, %48, %cst_25 {dimension_numbers = #tpu.dot_dimension_numbers<[1], [0], [0], [1], [0, 0, 1, 1], [], []>} : vector<8x8xbf16>, vector<8x32xbf16>, vector<8x32xf32> -> vector<8x32xf32>
    %59 = tpu.reciprocal %56 {approx = true} : vector<8x1xf32> -> vector<8x1xf32>
    %60 = vector.broadcast %59 : vector<8x1xf32> to vector<8x32xf32>
    %61 = arith.mulf %58, %60 : vector<8x32xf32>
    %62 = arith.truncf %61 : vector<8x32xf32> to vector<8x32xbf16>
    %63 = vector.extract_strided_slice %11 {offsets = [0, 96], sizes = [8, 32], strides = [1, 1]} : vector<8x128xbf16> to vector<8x32xbf16>
    %c0_26 = arith.constant 0 : index
    %c96 = arith.constant 96 : index
    %64 = vector.load %arg8[%c0_26, %c96] : memref<8x128xbf16, #tpu.memory_space<vmem>>, vector<8x32xbf16>
    %c0_27 = arith.constant 0 : index
    %c96_28 = arith.constant 96 : index
    %65 = vector.load %arg9[%c0_27, %c96_28] : memref<8x128xbf16, #tpu.memory_space<vmem>>, vector<8x32xbf16>
    %cst_29 = arith.constant dense<0.000000e+00> : vector<8x8xf32>
    %66 = tpu.matmul %63, %64, %cst_29 {dimension_numbers = #tpu.dot_dimension_numbers<[1], [1], [0], [0], [0, 0, 1, 0], [], []>} : vector<8x32xbf16>, vector<8x32xbf16>, vector<8x8xf32> -> vector<8x8xf32>
    %cst_30 = arith.constant dense<0xFF800000> : vector<8xf32>
    %67 = vector.multi_reduction <maximumf>, %66, %cst_30 [1] : vector<8x8xf32> to vector<8xf32>
    %68 = vector.shape_cast %67 : vector<8xf32> to vector<8x1xf32>
    %69 = vector.broadcast %68 : vector<8x1xf32> to vector<8x8xf32>
    %70 = arith.subf %66, %69 : vector<8x8xf32>
    %71 = math.exp %70 : vector<8x8xf32>
    %cst_31 = arith.constant dense<0.000000e+00> : vector<8xf32>
    %72 = vector.multi_reduction <add>, %71, %cst_31 [1] : vector<8x8xf32> to vector<8xf32>
    %73 = vector.shape_cast %72 : vector<8xf32> to vector<8x1xf32>
    %74 = arith.truncf %71 : vector<8x8xf32> to vector<8x8xbf16>
    %cst_32 = arith.constant dense<0.000000e+00> : vector<8x32xf32>
    %75 = tpu.matmul %74, %65, %cst_32 {dimension_numbers = #tpu.dot_dimension_numbers<[1], [0], [0], [1], [0, 0, 1, 1], [], []>} : vector<8x8xbf16>, vector<8x32xbf16>, vector<8x32xf32> -> vector<8x32xf32>
    %76 = tpu.reciprocal %73 {approx = true} : vector<8x1xf32> -> vector<8x1xf32>
    %77 = vector.broadcast %76 : vector<8x1xf32> to vector<8x32xf32>
    %78 = arith.mulf %75, %77 : vector<8x32xf32>
    %79 = arith.truncf %78 : vector<8x32xf32> to vector<8x32xbf16>
    %80 = tpu.concatenate %28, %45, %62, %79 in 1 : vector<8x32xbf16>, vector<8x32xbf16>, vector<8x32xbf16>, vector<8x32xbf16> -> vector<8x128xbf16>
    %c0_33 = arith.constant 0 : index
    %c0_34 = arith.constant 0 : index
    %81 = vector.load %arg5[%c0_33, %c0_34] : memref<128x32xbf16, #tpu.memory_space<vmem>>, vector<128x32xbf16>
    %cst_35 = arith.constant dense<0.000000e+00> : vector<8x32xf32>
    %82 = tpu.matmul %80, %81, %cst_35 {dimension_numbers = #tpu.dot_dimension_numbers<[1], [0], [0], [1], [0, 0, 1, 1], [], []>} : vector<8x128xbf16>, vector<128x32xbf16>, vector<8x32xf32> -> vector<8x32xf32>
    %c0_36 = arith.constant 0 : index
    %c0_37 = arith.constant 0 : index
    %83 = vector.load %arg6[%c0_36, %c0_37] : memref<1x32xf32, #tpu.memory_space<vmem>>, vector<1x32xf32>
    %84 = vector.broadcast %83 : vector<1x32xf32> to vector<8x32xf32>
    %85 = arith.addf %82, %84 : vector<8x32xf32>
    %c0_38 = arith.constant 0 : index
    %c0_39 = arith.constant 0 : index
    %c0_40 = arith.constant 0 : index
    %86 = vector.load %arg7[%c0_38, %c0_39, %c0_40] : memref<1x8x32xf32, #tpu.memory_space<vmem>>, vector<1x8x32xf32>
    %87 = vector.shape_cast %86 : vector<1x8x32xf32> to vector<8x32xf32>
    %88 = vector.shape_cast %85 : vector<8x32xf32> to vector<1x8x32xf32>
    tpu.vector_store %arg7[%c0_38, %c0_39, %c0_40], %88 {strides = array<i32>} : memref<1x8x32xf32, #tpu.memory_space<vmem>>, vector<1x8x32xf32>,
    return
  }
  func.func @transform_0(%arg0: i32, %arg1: i32) -> (i32, i32, i32) {
    %c0_i32 = arith.constant 0 : i32
    %c0_i32_0 = arith.constant 0 : i32
    %c0_i32_1 = arith.constant 0 : i32
    return %arg0, %c0_i32, %c0_i32_0 : i32, i32, i32
  }
  func.func @transform_1(%arg0: i32, %arg1: i32) -> (i32, i32) {
    %c0_i32 = arith.constant 0 : i32
    %c0_i32_0 = arith.constant 0 : i32
    %c0_i32_1 = arith.constant 0 : i32
    return %c0_i32, %c0_i32_0 : i32, i32
  }
  func.func @transform_2(%arg0: i32, %arg1: i32) -> (i32, i32) {
    %c0_i32 = arith.constant 0 : i32
    %c0_i32_0 = arith.constant 0 : i32
    %c0_i32_1 = arith.constant 0 : i32
    return %c0_i32, %c0_i32_0 : i32, i32
  }
  func.func @transform_3(%arg0: i32, %arg1: i32) -> (i32, i32) {
    %c0_i32 = arith.constant 0 : i32
    %c0_i32_0 = arith.constant 0 : i32
    %c0_i32_1 = arith.constant 0 : i32
    return %c0_i32, %c0_i32_0 : i32, i32
  }
  func.func @transform_4(%arg0: i32, %arg1: i32) -> (i32, i32) {
    %c0_i32 = arith.constant 0 : i32
    %c0_i32_0 = arith.constant 0 : i32
    %c0_i32_1 = arith.constant 0 : i32
    return %c0_i32, %c0_i32_0 : i32, i32
  }
  func.func @transform_5(%arg0: i32, %arg1: i32) -> (i32, i32, i32) {
    %c0_i32 = arith.constant 0 : i32
    %c0_i32_0 = arith.constant 0 : i32
    return %arg0, %arg1, %c0_i32 : i32, i32, i32
  }
}

</mosaic_0001>

<bundles_post_ra>
// kernel: tpu_custom_call.1
= control target key start
LH: loop header
LB: loop body
LE: loop exit
PB: predicated region body
PF: predicated region fallthrough
CT: control target
= control target key end

     0   :  { %10 = vsyncpa [#allocation5], 0  ;;  %s1633_s0 = inlined_call_operand.vmem [shape: f32[2,8,32], index: 0, kind: input, shape index: {}]   ;;  %s1634_s1 = inlined_call_operand.vmem [shape: bf16[32,128], index: 1, kind: input, shape index: {}]   ;;  %s1635_s2 = inlined_call_operand.vmem [shape: bf16[32,256], index: 2, kind: input, shape index: {}]   ;;  %s1636_s3 = inlined_call_operand.vmem [shape: bf16[128,32], index: 3, kind: input, shape index: {}]   ;;  %s1637_s4 = inlined_call_operand.vmem [shape: f32[1,32], index: 4, kind: input, shape index: {}]   ;;  %s1638_s5 = inlined_call_operand.hbm [shape: f32[2,8,32], index: 5, kind: output, shape index: {}]  }
   0x1   :  { %12 = vsyncpa [#allocation5 + $0x1], 0  ;;  %s1398_s18 = smov 0   ;;  %s1400_s19 = smov 0  }
   0x2   :  { %s1402_s20 = smov 0   ;;  %s1404_s21 = smov 0  }
   0x3   :  { %s1406_s22 = smov 0   ;;  %s1408_s23 = smov 0  }
   0x4 LB: > { %s1044_s24 = sadd.s32 4294967295, %s1359_s23   ;;  %s1045_s25 = sadd.s32 4294967294, %s1359_s23   ;;  %s1359_s23 = sphi %s1408_s23, %s18_s23   ;;  %s1355_s22 = sphi %s1406_s22, %s1645_s22   ;;  %s1351_s21 = sphi %s1404_s21, %s1644_s21   ;;  %s1347_s20 = sphi %s1402_s20, %s1643_s20   ;;  %s1343_s19 = sphi %s1400_s19, %s1642_s19   ;;  %s1339_s18 = sphi %s1398_s18, %s1641_s18  }
   0x5   : > { %s30_s26 = sadd.s32 1, %s1355_s22  ;;  %s149_s27 = sadd.s32 1, %s1347_s20 }
   0x6   : > { %p32_p0 = scmp.ge.s32.totalorder %s30_s26, 2  ;;  %p159_p1 = scmp.ne.s32.totalorder %s1347_s20, %s1343_s19 }
   0x7   : > { %p160_p2 = scmp.eq.s32.totalorder %s1044_s24, 1  ;;  %p165_p3 = scmp.ne.s32.totalorder %s1343_s19, %s1339_s18 }
   0x8   : > { %s1647_s26 = smov (%p32_p0, %s30_s26), 0  ;;  %p166_p5 = scmp.eq.s32.totalorder %s1045_s25, 1 }
   0x9   : > { %p1438_p4 = por %p160_p2, %p159_p1  ;;  %s144_s29 = ssub.s32 %s1355_s22, %s1647_s26 }
   0xa   : > { %p1048_p6 = scmp.ge.s32.totalorder %s1359_s23, 1  ;;  %p147_p7 = scmp.eq.s32.totalorder %s144_s29, 0 }
   0xb   : > { %p1445_p8 = por %p166_p5, %p165_p3  ;;  %p203_p9 = scmp.lt.s32.totalorder %s1359_s23, 3 }
   0xc   : > { %s1451_s6 = scalar_select %p147_p7, %s1347_s20, %s149_s27  }
   0xd   : > { %p204_p10 = pnand %p1048_p6, %p203_p9 }
   0xe   : > { %v1247_v0 = vld [vmem:[%s1635_s2 + $0x4] ss:$8 sps:$4 sm:$0xff] (!%p204_p10)   ;;  %p230_p11 = scmp.lt.s32.totalorder (!%p204_p10), %s1351_s21, 1  ;;  %v1249_v1 = vld [vmem:[%s1635_s2] ss:$8 sps:$4 sm:$0xff] (!%p204_p10)   ;;  %v1361_v2 = vmov (!%p204_p10), 0  }
   0xf   : > { %207 = sbr.rel (%p204_p10) target bundleno = 1324 (0x52c), region = 40  ;;  %301 = vmatprep.mubr.bf16.mxu1 (!%p204_p10), %v1361_v2  ;;  %269 = vmatprep.subr.bf16.mxu1 (!%p204_p10), %v1247_v0  ;;  %v1250_v3 = vld [vmem:[%s1635_s2 + $0x14] ss:$8 sps:$4 sm:$0xff] (!%p204_p10)   ;;  %v1252_v4 = vld [vmem:[%s1635_s2 + $0x10] ss:$8 sps:$4 sm:$0xff] (!%p204_p10)   ;;  %v1362_v5 = vmov (!%p204_p10), 0.0  }
  0x10   : > { %1130 = vmatprep.subr.bf16.mxu0 (!%p204_p10), %v1362_v5  ;;  %270 = vmatpush1.bf16.msra.mxu1 (!%p204_p10), %v1249_v1  ;;  %v1253_v6 = vld [vmem:[%s1634_s1] sm:$0xff] (!%p204_p10)   ;;  %vm1363_vm0 = vmmov (!%p204_p10), 0   ;;  %vm265_vm1 = vcmask (!%p204_p10), 261120   ;;  %v1254_v9 = vld [vmem:[%s1634_s1 + $0x8] sm:$0xff] (!%p204_p10)   ;;  %s1364_s9 = smov (!%p204_p10), 64   ;;  %s1365_s10 = smov (!%p204_p10), 96  }
  0x11   : > { %271 = vmatprep.subr.bf16.mxu1 (!%p204_p10), %v1250_v3  ;;  %1132 = vmatprep.mubr.msk.bf16.mxu0 (!%p204_p10), %vm1363_vm0, %v1362_v5  ;;  %vm441_vm2 = vcmask (!%p204_p10), 1043456   ;;  %s1366_s11 = smov (!%p204_p10), 32   ;;  %vm427_vm3 = vcmask (!%p204_p10), 64512   ;;  %vm840_vm4 = vcmask (!%p204_p10), 523264   ;;  %vm843_vm5 = vcmask (!%p204_p10), 785408   ;;  %s1079_s17 = sshll.u32 (!%p204_p10), %s1351_s21, 7 }
  0x12   : > { %s1585_s7 = scalar_lea.hbm (!%p204_p10), %s1638_s5, %s1079_s17  ;;  %s1367_s12 = smov (!%p204_p10), [#allocation4]  }
  0x13   : > { %s1285_s13 = sshll.u32 (!%p204_p10), %s1367_s12, 4  ;;  %s1286_s13 = int_to_ptr.vmem [resolvable:$false] %s1285_s13 }
  0x14   : > { %272 = vmatpush1.bf16.msra.mxu1 (!%p204_p10), %v1252_v4  ;;  %s1287_s14 = scalar_lea.vmem (!%p204_p10), %s1286_s13, 256 }
  0x15   : > { %1110 = vmatprep.subr.bf16.mxu1 (!%p204_p10), %v1362_v5 }
  0x16   : > { %s231_s15 = scalar_select %p230_p11, %s1351_s21, 1 }
  0x18   : > { %s1050_s16 = sshll.u32 %s231_s15, 3 }
  0x19   : > { %s233_s25 = scalar_lea.vmem %s1633_s0, %s1050_s16 }
  0x1a   : > { %v239_v7 = vld [vmem:[%s233_s25] sm:$0xff] }
  0x1b   : > { %v240_v8 = vpack.c.bf16 %v239_v7, %v239_v7 }
  0x1d   : > { %1055 = vmatmul.mubr.msk.bf16.vlgmr.msra.gmra.mrb[0].mxu1 %vm265_vm1, %v240_v8 }
  0x1e   : > { %1111 = vmatpush3.bf16.msra.mxu1 %v1253_v6  ;;  %1114 = vmatprep.mubr.msk.bf16.mxu1 %vm1363_vm0, %v1362_v5 }
  0x1f   : > { %1112 = vmatprep.subr.bf16.mxu1 %v1362_v5 }
  0x22   : > { %1113 = vmatpush3.bf16.msra.mxu1 %v1254_v9 }
  0x23   : > { %1118 = vmatprep.subr.bf16.mxu1 %v1362_v5 }
  0x25   : > { %1115 = vmatmul.mubr.msk.bf16.vlgmr.msra.gmra.mrb[4].mxu1 %vm265_vm1, %v240_v8 }
  0x26   : > { %1120 = vmatprep.mubr.msk.bf16.mxu1 %vm1363_vm0, %v1362_v5 }
  0xf0   : > { %v303_v10 = vpop.f32.mrb[0].mxu1 }
  0xf1   : > { %v310_v11 = vpack.c.bf16 %v303_v10, %v303_v10  ;;  %v305_v12 = vpop.f32.mrb[1].mxu1 }
  0xf2   : > { %v312_v13 = vpack.c.bf16 %v305_v12, %v305_v12  ;;  %v307_v14 = vpop.f32.mrb[2].mxu1 }
  0xf3   : > { %311 = vst [vmem:[#allocation2] sm:$0xf] %v310_v11  ;;  %v308_v15 = vpop.f32.mrb[3].mxu1 }
  0xf4   : > { %313 = vst [vmem:[#allocation3] sm:$0xf] %v312_v13 }
  0xf8   : > { %v372_v16 = vpop.f32.mrb[4].mxu1 }
  0xf9   : > { %v1116_v17 = vpop.f32.mrb[5].mxu1  ;;  %v378_v23 = vpack.c.bf16 %v372_v16, %v372_v16 }
  0xfa   : > { %v379_v18 = vld [vmem:[#allocation2] sm:$0xf]  ;;  %v375_v19 = vpop.f32.mrb[6].mxu1 }
  0xfb   : > { %v385_v20 = vsel %vm265_vm1, %v379_v18, 0  ;;  %v1061_v21 = vcombine.low %v379_v18, %v379_v18  ;;  %v1117_v22 = vpop.f32.mrb[7].mxu1  ;;  %v380_v24 = vld [vmem:[#allocation3] sm:$0xf] }
  0xfc   : > { %1119 = vmatpush3.bf16.xpose.msra.mxu1 %v385_v20  ;;  %v443_v25 = vsel %vm441_vm2, %v380_v24, 0  ;;  %v1063_v53 = vcombine.low %v380_v24, %v380_v24 }
  0xfd   : > { %608 = vrot.lane.b32.xlu1 %v1061_v21, %s1364_s9  ;;  %494 = vrot.lane.b32.xlu0 %v1061_v21, %s1365_s10 }
  0xfe   : > { %1124 = vmatprep.subr.bf16.mxu1 %v1362_v5 }
 0x101   : > { %606 = vrot.lane.b32.xlu1 %v378_v23, %s1364_s9  ;;  %489 = vrot.lane.b32.xlu0 %v378_v23, %s1365_s10 }
 0x103   : > { %1121 = vmatmul.mubr.msk.bf16.vlgmr.msra.gmra.mrb[8].mxu1 %vm265_vm1, %v378_v23 }
 0x104   : > { %1125 = vmatpush3.bf16.msra.mxu1 %v443_v25  ;;  %1126 = vmatprep.mubr.msk.bf16.mxu1 %vm1363_vm0, %v1362_v5 }
 0x105   : > { %717 = vrot.lane.b32.xlu1 %v378_v23, %s1366_s11  ;;  %719 = vrot.lane.b32.xlu0 %v1061_v21, %s1366_s11 }
 0x106   : > { %1136 = vmatprep.subr.bf16.mxu1 %v1362_v5 }
 0x16f   : > { %v495_v26 = vpop.permute.xlu0 %494  ;;  %v609_v28 = vpop.permute.xlu1 %608 }
 0x170   : > { %v500_v27 = vsel %vm265_vm1, %v495_v26, 0  ;;  %v614_v30 = vsel %vm265_vm1, %v609_v28, 0  ;;  %v1258_v28 = vld [vmem:[%s1636_s3 + $0x8] sm:$0xff]  }
 0x171   : > { %1131 = vmatpush3.bf16.xpose.msra.mxu0 %v500_v27  ;;  %v1257_v27 = vld [vmem:[%s1636_s3] sm:$0xff]  }
 0x172   : > { %1142 = vmatprep.subr.bf16.mxu0 %v1362_v5 }
 0x173   : > { %v490_v29 = vpop.permute.xlu0 %489  ;;  %v607_v32 = vpop.permute.xlu1 %606 }
 0x177   : > { %v720_v31 = vpop.permute.xlu0 %719  ;;  %v718_v34 = vpop.permute.xlu1 %717 }
 0x178   : > { %1133 = vmatmul.mubr.msk.bf16.vlgmr.msra.gmra.mrb[0].mxu0 %vm265_vm1, %v490_v29  ;;  %v725_v33 = vsel %vm265_vm1, %v720_v31, 0  ;;  %v1259_v29 = vld [vmem:[%s1636_s3 + $0x10] sm:$0xff]  }
 0x179   : > { %1143 = vmatpush3.bf16.xpose.msra.mxu0 %v614_v30  ;;  %1144 = vmatprep.mubr.msk.bf16.mxu0 %vm1363_vm0, %v1362_v5  ;;  %v1260_v30 = vld [vmem:[%s1636_s3 + $0x18] sm:$0xff]  }
 0x17a   : > { %1154 = vmatprep.subr.bf16.mxu0 %v1362_v5 }
 0x180   : > { %1145 = vmatmul.mubr.msk.bf16.vlgmr.msra.gmra.mrb[4].mxu0 %vm265_vm1, %v607_v32  ;;  %v1261_v32 = vld [vmem:[%s1636_s3 + $0x20] sm:$0xff]  }
 0x181   : > { %1155 = vmatpush3.bf16.xpose.msra.mxu0 %v725_v33  ;;  %1156 = vmatprep.mubr.msk.bf16.mxu0 %vm1363_vm0, %v1362_v5  ;;  %v1262_v33 = vld [vmem:[%s1636_s3 + $0x28] sm:$0xff]  }
 0x182   : > { %1166 = vmatprep.subr.bf16.mxu0 %v1362_v5 }
 0x188   : > { %1157 = vmatmul.mubr.msk.bf16.vlgmr.msra.gmra.mrb[8].mxu0 %vm265_vm1, %v718_v34 }
 0x189   : > { %1182 = vmatprep.mubr.msk.bf16.mxu0 %vm1363_vm0, %v1362_v5  ;;  %1167 = vmatpush3.bf16.msra.mxu0 %v1257_v27 }
 0x18a   : > { %1168 = vmatprep.subr.bf16.mxu0 %v1362_v5 }
 0x18d   : > { %1169 = vmatpush3.bf16.msra.mxu0 %v1258_v28 }
 0x18e   : > { %1170 = vmatprep.subr.bf16.mxu0 %v1362_v5 }
 0x191   : > { %1171 = vmatpush3.bf16.msra.mxu0 %v1259_v29 }
 0x192   : > { %1172 = vmatprep.subr.bf16.mxu0 %v1362_v5 }
 0x195   : > { %1173 = vmatpush3.bf16.msra.mxu0 %v1260_v30 }
 0x196   : > { %1174 = vmatprep.subr.bf16.mxu0 %v1362_v5 }
 0x199   : > { %1175 = vmatpush3.bf16.msra.mxu0 %v1261_v32 }
 0x19a   : > { %1176 = vmatprep.subr.bf16.mxu0 %v1362_v5 }
 0x19d   : > { %1177 = vmatpush3.bf16.msra.mxu0 %v1262_v33 }
 0x19e   : > { %1178 = vmatprep.subr.bf16.mxu0 %v1362_v5 }
 0x1d6   : > { %v421_v35 = vpop.f32.mrb[8].mxu1 }
 0x1d7   : > { %v1122_v36 = vpop.f32.mrb[9].mxu1  ;;  %v428_v37 = vsel %vm427_vm3, %v421_v35, -inf }
 0x1d8   : > { %429 = vmax.xlane.f32.xlu0 %v428_v37  ;;  %v424_v38 = vpop.f32.mrb[10].mxu1  ;;  %v1263_v37 = vld [vmem:[%s1636_s3 + $0x30] sm:$0xff]  }
 0x1d9   : > { %v1123_v39 = vpop.f32.mrb[11].mxu1  ;;  %1179 = vmatpush3.bf16.msra.mxu0 %v1263_v37 }
 0x1da   : > { %1180 = vmatprep.subr.bf16.mxu0 %v1362_v5 }
 0x24b   : > { %v536_v40 = vpop.f32.mrb[0].mxu0 }
 0x24c   : > { %v1134_v41 = vpop.f32.mrb[1].mxu0  ;;  %v542_v42 = vsel %vm427_vm3, %v536_v40, -inf }
 0x24d   : > { %543 = vmax.xlane.f32.xlu1 %v542_v42  ;;  %v539_v43 = vpop.f32.mrb[2].mxu0  ;;  %v1264_v41 = vld [vmem:[%s1636_s3 + $0x38] sm:$0xff]  }
 0x24e   : > { %v1135_v44 = vpop.f32.mrb[3].mxu0  ;;  %1181 = vmatpush3.bf16.msra.mxu0 %v1264_v41 }
 0x253   : > { %v650_v45 = vpop.f32.mrb[4].mxu0 }
 0x254   : > { %v1146_v46 = vpop.f32.mrb[5].mxu0  ;;  %v656_v47 = vsel %vm427_vm3, %v650_v45, -inf }
 0x255   : > { %v653_v48 = vpop.f32.mrb[6].mxu0  ;;  %657 = vmax.xlane.f32.xlu0 %v656_v47 }
 0x256   : > { %v1147_v49 = vpop.f32.mrb[7].mxu0 }
 0x25b   : > { %v761_v50 = vpop.f32.mrb[8].mxu0 }
 0x25c   : > { %v1158_v51 = vpop.f32.mrb[9].mxu0  ;;  %v767_v52 = vsel %vm427_vm3, %v761_v50, -inf }
 0x25d   : > { %v764_v54 = vpop.f32.mrb[10].mxu0  ;;  %768 = vmax.xlane.f32.xlu0 %v767_v52 }
 0x25e   : > { %555 = vrot.lane.b32.xlu1 %v1063_v53, %s1365_s10  ;;  %v1159_v55 = vpop.f32.mrb[11].mxu0 }
 0x262   : > { %777 = vrot.lane.b32.xlu1 %v1063_v53, %s1366_s11 }
 0x265   : > { %v430_v56 = vpop.xlane.xlu0 %429 }
 0x266   : > { %v431_v57 = vsub.f32 %v421_v35, %v430_v56 }
 0x268   : > { %v432_v58 = vmul.f32 1.442695, %v431_v57 }
 0x26a   : > { %1265 = vpow2.f32 %v432_v58 }
 0x273   : > { %666 = vrot.lane.b32.xlu0 %v1063_v53, %s1364_s9 }
 0x274   : > { %v1266_v59 = vpop.eup %1265 }
 0x275   : > { %v437_v60 = vpack.c.bf16 %v1266_v59, %v1266_v59  ;;  %v434_v13 = vsel %vm427_vm3, %v1266_v59, 0.0 }
 0x277   : > { %1127 = vmatmul.mubr.msk.bf16.vlgmr.msra.gmra.mrb[12].mxu1 %vm427_vm3, %v437_v60 }
 0x278   : > { %1138 = vmatprep.mubr.msk.bf16.mxu1 %vm1363_vm0, %v1362_v5 }
 0x2da   : > { %v544_v61 = vpop.xlane.xlu1 %543 }
 0x2db   : > { %v545_v62 = vsub.f32 %v536_v40, %v544_v61 }
 0x2dd   : > { %v546_v63 = vmul.f32 1.442695, %v545_v62 }
 0x2de   : > { %v556_v0 = vpop.permute.xlu1 %555 }
 0x2df   : > { %1267 = vpow2.f32 %v546_v63  ;;  %v561_v1 = vsel %vm441_vm2, %v556_v0, 0 }
 0x2e0   : > { %1137 = vmatpush3.bf16.msra.mxu1 %v561_v1 }
 0x2e1   : > { %1148 = vmatprep.subr.bf16.mxu1 %v1362_v5 }
 0x2e2   : > { %v658_v2 = vpop.xlane.xlu0 %657  ;;  %v778_v16 = vpop.permute.xlu1 %777 }
 0x2e3   : > { %v659_v3 = vsub.f32 %v650_v45, %v658_v2  ;;  %v783_v19 = vsel %vm441_vm2, %v778_v16, 0 }
 0x2e5   : > { %v660_v4 = vmul.f32 1.442695, %v659_v3 }
 0x2e7   : > { %1269 = vpow2.f32 %v660_v4  ;;  %v1069_v4 = vld [vmem:[%s1637_s4] ss:$0 sm:$0xff] }
 0x2e9   : > { %v1268_v6 = vpop.eup %1267 }
 0x2ea   : > { %v769_v7 = vpop.xlane.xlu0 %768  ;;  %v548_v8 = vsel %vm427_vm3, %v1268_v6, 0.0  ;;  %v551_v9 = vpack.c.bf16 %v1268_v6, %v1268_v6 }
 0x2eb   : > { %v770_v10 = vsub.f32 %v761_v50, %v769_v7  ;;  %549 = vadd.xlane.f32.xlu1 %v548_v8 }
 0x2ec   : > { %1139 = vmatmul.mubr.msk.bf16.vlgmr.msra.gmra.mrb[16].mxu1 %vm427_vm3, %v551_v9 }
 0x2ed   : > { %v771_v11 = vmul.f32 1.442695, %v770_v10  ;;  %1150 = vmatprep.mubr.msk.bf16.mxu1 %vm1363_vm0, %v1362_v5 }
 0x2ee   : > { %v667_v12 = vpop.permute.xlu0 %666 }
 0x2ef   : > { %1271 = vpow2.f32 %v771_v11  ;;  %v672_v14 = vsel %vm441_vm2, %v667_v12, 0  ;;  %435 = vadd.xlane.f32.xlu1 %v434_v13 }
 0x2f0   : > { %1149 = vmatpush3.bf16.msra.mxu1 %v672_v14 }
 0x2f1   : > { %v1270_v15 = vpop.eup %1269  ;;  %1160 = vmatprep.subr.bf16.mxu1 %v1362_v5 }
 0x2f2   : > { %v662_v17 = vsel %vm427_vm3, %v1270_v15, 0.0  ;;  %v665_v18 = vpack.c.bf16 %v1270_v15, %v1270_v15 }
 0x2f3   : > { %663 = vadd.xlane.f32.xlu0 %v662_v17 }
 0x2f4   : > { %1151 = vmatmul.mubr.msk.bf16.vlgmr.msra.gmra.mrb[20].mxu1 %vm427_vm3, %v665_v18 }
 0x2f5   : > { %1161 = vmatpush3.bf16.msra.mxu1 %v783_v19  ;;  %1162 = vmatprep.mubr.msk.bf16.mxu1 %vm1363_vm0, %v1362_v5 }
 0x2f9   : > { %v1272_v20 = vpop.eup %1271 }
 0x2fa   : > { %v773_v21 = vsel %vm427_vm3, %v1272_v20, 0.0  ;;  %v776_v22 = vpack.c.bf16 %v1272_v20, %v1272_v20 }
 0x2fb   : > { %774 = vadd.xlane.f32.xlu0 %v773_v21 }
 0x2fc   : > { %1163 = vmatmul.mubr.msk.bf16.vlgmr.msra.gmra.mrb[24].mxu1 %vm427_vm3, %v776_v22 }
 0x34a   : > { %v479_v23 = vpop.f32.mrb[12].mxu1 }
 0x34b   : > { %v1128_v24 = vpop.f32.mrb[13].mxu1 }
 0x34c   : > { %v482_v25 = vpop.f32.mrb[14].mxu1 }
 0x34d   : > { %v1129_v26 = vpop.f32.mrb[15].mxu1 }
 0x378   : > { %v550_v31 = vpop.xlane.xlu1 %549 }
 0x379   : > { %1273 = vrcp.f32 %v550_v31 }
 0x37c   : > { %v436_v58 = vpop.xlane.xlu1 %435 }
 0x380   : > { %v664_v34 = vpop.xlane.xlu0 %663 }
 0x381   : > { %1275 = vrcp.f32 %v664_v34 }
 0x383   : > { %v1274_v35 = vpop.eup %1273 }
 0x388   : > { %v775_v42 = vpop.xlane.xlu0 %774 }
 0x389   : > { %1277 = vrcp.f32 %v775_v42 }
 0x38a   : > { %1279 = vrcp.f32 %v436_v58 }
 0x38b   : > { %v1276_v45 = vpop.eup %1275 }
 0x393   : > { %v1278_v52 = vpop.eup %1277 }
 0x394   : > { %v1280_v59 = vpop.eup %1279 }
 0x395   : > { %v486_v60 = vmul.f32 %v1280_v59, %v479_v23 }
 0x397   : > { %v487_v63 = vpack.c.bf16 %v486_v60, %v486_v60 }
 0x3bf   : > { %v597_v36 = vpop.f32.mrb[16].mxu1 }
 0x3c0   : > { %v604_v38 = vmul.f32 %v1274_v35, %v597_v36  ;;  %v1140_v39 = vpop.f32.mrb[17].mxu1 }
 0x3c1   : > { %v600_v40 = vpop.f32.mrb[18].mxu1 }
 0x3c2   : > { %v605_v43 = vpack.c.bf16 %v604_v38, %v604_v38  ;;  %v1141_v44 = vpop.f32.mrb[19].mxu1 }
 0x3c4   : > { %829 = vrot.lane.b32.xlu0 %v605_v43, %s1366_s11 }
 0x3c7   : > { %v708_v46 = vpop.f32.mrb[20].mxu1 }
 0x3c8   : > { %v715_v47 = vmul.f32 %v1276_v45, %v708_v46  ;;  %v1152_v48 = vpop.f32.mrb[21].mxu1 }
 0x3c9   : > { %v711_v49 = vpop.f32.mrb[22].mxu1 }
 0x3ca   : > { %v716_v50 = vpack.c.bf16 %v715_v47, %v715_v47  ;;  %v1153_v51 = vpop.f32.mrb[23].mxu1 }
 0x3cc   : > { %832 = vrot.lane.b32.xlu1 %v716_v50, %s1364_s9  ;;  %s227_s9 = sand.u32 1, %s1343_s19  }
 0x3cd   : > { %s1049_s11 = sshll.u32 %s227_s9, 3  ;;  %s960_s21 = scalar_lea.sflag [#allocation5], %s227_s9 }
 0x3ce   : > { %s229_s24 = scalar_lea.vmem [#allocation4], %s1049_s11 }
 0x3cf   : > { %v819_v53 = vpop.f32.mrb[24].mxu1  ;;  %s974_s25 = sshll.u32 %s229_s24, 4  ;;  %s1587_s25 = int_to_ptr.vmem [resolvable:$true] %s974_s25 }
 0x3d0   : > { %v826_v54 = vmul.f32 %v1278_v52, %v819_v53  ;;  %v1164_v55 = vpop.f32.mrb[25].mxu1  ;;  %s1281_s8 = scalar_lea.vmem %s1587_s25, 128  ;;  %p1288_p1 = scmp.lt.s32.totalorder %s1587_s25, %s1286_s13 }
 0x3d1   : > { %v822_v56 = vpop.f32.mrb[26].mxu1  ;;  %p1282_p12 = scmp.ne.s32.totalorder %s1587_s25, %s1281_s8  ;;  %p1289_p2 = scmp.lt.s32.totalorder %s1287_s14, %s1281_s8 }
 0x3d2   : > { %v827_v57 = vpack.c.bf16 %v826_v54, %v826_v54  ;;  %v1165_v5 = vpop.f32.mrb[27].mxu1 }
 0x3d3   : > { %p1283_p13 = pnand %p1282_p12, %p1438_p4  ;;  %p1290_p3 = por %p1289_p2, %p1288_p1 }
 0x3d4   : > { %835 = vrot.lane.b32.xlu1 %v827_v57, %s1365_s10 }
 0x3d5   : > { %p1284_p0 = pneg %p1283_p13 }
 0x3d7   : > { %p1291_p5 = pnand %p1290_p3, %p1284_p0 }
 0x436   : > { %v830_v61 = vpop.permute.xlu0 %829 }
 0x437   : > { %v839_v0 = vsel %vm265_vm1, %v487_v63, %v830_v61 }
 0x43e   : > { %v833_v62 = vpop.permute.xlu1 %832 }
 0x43f   : > { %v842_v1 = vsel %vm840_vm4, %v839_v0, %v833_v62 }
 0x446   : > { %v836_v2 = vpop.permute.xlu1 %835 }
 0x447   : > { %v845_v3 = vsel %vm843_vm5, %v842_v1, %v836_v2 }
 0x448   : > { %1183 = vmatmul.mubr.bf16.vlgmr.msra.gmra.mrb[12].mxu0 %v845_v3 }
 0x51b   : > { %v952_v6 = vpop.f32.mrb[12].mxu0 }
 0x51c   : > { %v953_v7 = vadd.f32 %v1069_v4, %v952_v6  ;;  %v1184_v8 = vpop.f32.mrb[13].mxu0 }
 0x51d   : > { %v955_v9 = vpop.f32.mrb[14].mxu0 }
 0x51e   : > { %v1185_v10 = vpop.f32.mrb[15].mxu0  ;;  %958 = vst.msk [vmem:[%s229_s24] sm:$0xff] %vm265_vm1, %v953_v7 }
 0x51f   : > { %1294 = shalt.err (!%p1291_p5)
}
 0x520   : > { %s1295_s15 = scalar_lea.hbm %s1585_s7, 128  ;;  %s1299_s16 = scalar_lea.hbm %s1638_s5, 256 }
 0x521   : > { %p1296_p6 = scmp.ne.s32.totalorder %s1585_s7, %s1295_s15  ;;  %p1300_p10 = scmp.lt.u32.totalorder %s1585_s7, %s1638_s5 }
 0x522   : > { %p1301_p11 = scmp.lt.u32.totalorder %s1299_s16, %s1295_s15  ;;  %p1303_p13 = scmp.lt.u32.totalorder %s1295_s15, %s1585_s7 }
 0x523   : > { %p1297_p7 = pnand %p1296_p6, %p1438_p4 }
 0x524   : > { %p1302_p12 = por %p1301_p11, %p1300_p10 }
 0x525   : > { %p1298_p9 = pneg %p1297_p7 }
 0x526   : > { %p1304_p0 = por %p1303_p13, %p1302_p12 }
 0x528   : > { %p1305_p1 = pnand %p1304_p0, %p1298_p9 }
 0x52a   : > { %1308 = shalt.err (!%p1305_p1)
}
 0x52b   : > { %1186 = dma.vmem_to_hbm [thread:$0]  (%p1438_p4), %s1587_s25, 128, %s1585_s7, %s960_s21  }
 0x52c PF: > { %p1192_p2 = scmp.ge.s32.totalorder %s1359_s23, 2  ;;  %s986_s24 = sand.u32 1, %s1339_s18  }
 0x52d   : > { %s987_s27 = scalar_lea.sflag [#allocation5], %s986_s24 }
 0x52e   : > { %p1189_p3 = pnand %p1192_p2, %p1445_p8 }
 0x530   : > { %1334 = dma.done.wait (!%p1189_p3), %s987_s27, 128  }
 0x531   : > { %1336 = vsyncadd (!%p1189_p3), %s987_s27, 4294967168  ;;  %s18_s23 = sadd.s32 1, %s1359_s23   ;;  %s1641_s18 = smov %s1343_s19 }
 0x532   : > { %p15_p5 = scmp.ge.s32.totalorder %s18_s23, 4   ;;  %s1642_s19 = smov %s1347_s20 }
 0x533   : > { %s1643_s20 = smov %s1451_s6  ;;  %s1644_s21 = smov %s1355_s22 }
 0x534   : > { %s1645_s22 = smov %s1647_s26  ;;  %17 = sbr.rel (!%p15_p5) target bundleno = 4 (0x4), region = 80 }
 0x53b   :  { %992 = vsyncpa [#allocation5], 1 }
 0x53c   :  { %994 = vsyncpa [#allocation5 + $0x1], 1 }

</bundles_post_ra>
